<compile_context>
chip_gen: v5e
topology: v5e:2x2
jax: 0.10.0
libtpu: 0.0.40
codegen_flags: <defaults>
</compile_context>

<pallas_src>
import functools

import jax
import jax.numpy as jnp
from jax.experimental import pallas as pl
from jax.experimental.pallas import tpu as pltpu

_NEG_LARGE = -1e30  # effectively -inf for f32 softmax masking


def _round_up(x, m):
    return ((x + m - 1) // m) * m


def _cdiv(a, b):
    return (a + b - 1) // b


def _gated_attention_kernel(feat_ref, wvu_ref, bvu_ref, ww_ref, bwt_ref,
                            logits_ref, m_ref, l_ref, pooled_ref,
                            *, hidden_dims, n_valid, tiles_per_split):
    """Process one (TN, L) tile of instances: projections + online softmax."""
    c = pl.program_id(0)          # split index   ("parallel" axis)
    i = pl.program_id(1)          # tile-in-split ("arbitrary" reduction axis)
    tile_n = feat_ref.shape[0]

    @pl.when(i == 0)
    def _init():
        m_ref[...] = jnp.full(m_ref.shape, -jnp.inf, dtype=m_ref.dtype)
        l_ref[...] = jnp.zeros(l_ref.shape, dtype=l_ref.dtype)
        pooled_ref[...] = jnp.zeros(pooled_ref.shape, dtype=pooled_ref.dtype)

    feats = feat_ref[...]                                              # (TN, L)

    # Fused V/U projection: a single MXU matmul, then split + gate (VPU/EUP).
    h = (jnp.dot(feats, wvu_ref[...], preferred_element_type=jnp.float32)
         + bvu_ref[...])                                               # (TN, 2D)
    gated = jnp.tanh(h[:, :hidden_dims]) * jax.nn.sigmoid(h[:, hidden_dims:])

    # Attention logits directly in transposed (K, TN) layout: contract over D
    # with dot_general so no XLU transpose is ever emitted.
    logits_t = jax.lax.dot_general(
        ww_ref[...], gated,
        dimension_numbers=(((0,), (1,)), ((), ())),
        preferred_element_type=jnp.float32) + bwt_ref[...]             # (K, TN)

    # Mask instance slots past the true N (wrapper zero-pads features).
    col = ((c * tiles_per_split + i) * tile_n
           + jax.lax.broadcasted_iota(jnp.int32, logits_t.shape, 1))
    valid = col < n_valid
    logits_t = jnp.where(valid, logits_t, _NEG_LARGE)
    logits_ref[...] = logits_t      # streamed out; normalized in the epilogue

    # Online softmax + un-normalized pooled accumulation for this split.
    m_prev = m_ref[0]                                                  # (K, 1)
    m_new = jnp.maximum(m_prev, jnp.max(logits_t, axis=1, keepdims=True))
    alpha = jnp.exp(m_prev - m_new)
    p = jnp.where(valid, jnp.exp(logits_t - m_new), 0.0)               # (K, TN)
    l_ref[0] = alpha * l_ref[0] + jnp.sum(p, axis=1, keepdims=True)
    pooled_ref[0] = (alpha * pooled_ref[0]
                     + jnp.dot(p, feats, preferred_element_type=jnp.float32))
    m_ref[0] = m_new


def gated_attention_forward(features, params, *, block_n=None, num_splits=2):
    """Forward pass of GatedAttentionLayer.

    params = (w_v, b_v, w_u, b_u, w_w, b_w) with weights pre-transposed to
    (in_features, out_features) and biases shaped (1, out_features).
    Returns (attention_weights (K, N), pooled_features (K, L)).
    """
    wv, bv, wu, bu, ww, bw = params
    input_dims, hidden_dims = wv.shape
    attention_dims = ww.shape[1]

    feats = jnp.asarray(features, jnp.float32).reshape(-1, input_dims)
    n = feats.shape[0]

    # ---- tile-size selection (VMEM-budget driven) --------------------------
    if block_n is None:
        # ~8 MiB per streamed feats buffer (x2 double-buffered) leaves ample
        # headroom inside v7x's 64 MiB VMEM; >=512 rows amortizes the
        # ~0.35 us/grid-step overhead.
        block_n = max(512, ((8 * 1024 * 1024) // (4 * input_dims)) // 128 * 128)
    if n <= block_n:
        tile_n = _round_up(max(n, 1), 8)     # single tile, sublane aligned
        num_splits = 1
    else:
        tile_n = _round_up(block_n, 128)     # lane-dense (K, TN) logit blocks

    num_valid_tiles = _cdiv(n, tile_n)
    num_splits = max(1, min(num_splits, num_valid_tiles))
    total_tiles = _round_up(num_valid_tiles, num_splits)
    tiles_per_split = total_tiles // num_splits
    n_pad = total_tiles * tile_n
    if n_pad != n:
        feats = jnp.pad(feats, ((0, n_pad - n), (0, 0)))

    # Pack V/U projections into a single matmul; pre-transpose b_w to (K, 1).
    w_vu = jnp.concatenate([wv, wu], axis=1)             # (L, 2D)
    b_vu = jnp.concatenate([bv, bu], axis=1)             # (1, 2D)
    bw_t = jnp.reshape(bw, (attention_dims, 1))          # (K, 1)

    kernel = functools.partial(
        _gated_attention_kernel,
        hidden_dims=hidden_dims, n_valid=n, tiles_per_split=tiles_per_split)

    logits_t, m_part, l_part, pooled_part = pl.pallas_call(
        kernel,
        out_shape=(
            jax.ShapeDtypeStruct((attention_dims, n_pad), jnp.float32),
            jax.ShapeDtypeStruct((num_splits, attention_dims, 1), jnp.float32),
            jax.ShapeDtypeStruct((num_splits, attention_dims, 1), jnp.float32),
            jax.ShapeDtypeStruct((num_splits, attention_dims, input_dims),
                                 jnp.float32),
        ),
        grid_spec=pltpu.PrefetchScalarGridSpec(
            num_scalar_prefetch=0,
            grid=(num_splits, tiles_per_split),
            in_specs=[
                # streamed feature tiles
                pl.BlockSpec((tile_n, input_dims),
                             lambda c, i: (c * tiles_per_split + i, 0)),
                # small weights / biases stay resident in VMEM
                pl.BlockSpec((input_dims, 2 * hidden_dims), lambda c, i: (0, 0)),
                pl.BlockSpec((1, 2 * hidden_dims), lambda c, i: (0, 0)),
                pl.BlockSpec((hidden_dims, attention_dims), lambda c, i: (0, 0)),
                pl.BlockSpec((attention_dims, 1), lambda c, i: (0, 0)),
            ],
            out_specs=(
                # per-tile transposed logits: lane-dense (K, TN) blocks
                pl.BlockSpec((attention_dims, tile_n),
                             lambda c, i: (0, c * tiles_per_split + i)),
                # per-split softmax stats & un-normalized pooled accumulator,
                # resident across the inner ("arbitrary") reduction axis
                pl.BlockSpec((1, attention_dims, 1), lambda c, i: (c, 0, 0)),
                pl.BlockSpec((1, attention_dims, 1), lambda c, i: (c, 0, 0)),
                pl.BlockSpec((1, attention_dims, input_dims),
                             lambda c, i: (c, 0, 0)),
            ),
        ),
        compiler_params=pltpu.CompilerParams(
            dimension_semantics=("parallel", "arbitrary"),
            vmem_limit_bytes=64 * 1024 * 1024,
        ),
    )(feats, w_vu, b_vu, ww, bw_t)

    # ---- tiny epilogue: merge split partials & normalize -------------------
    # Flash-decode style combine; needs the *global* softmax stats, so it runs
    # after the streaming pass. O(K*(N+L)) elementwise, negligible vs feats IO.
    m = jnp.max(m_part, axis=0)                           # (K, 1)
    scale = jnp.exp(m_part - m)                           # (S, K, 1)
    denom = jnp.sum(l_part * scale, axis=0)               # (K, 1)
    pooled = jnp.sum(pooled_part * scale, axis=0) / denom           # (K, L)
    attn = jnp.exp(logits_t[:, :n] - m) / denom                     # (K, N)
    return attn, pooled


def init_params(key, input_dims, hidden_dims, attention_dims):
    """Deterministic init mimicking torch.nn.Linear defaults; weights stored
    transposed as (in, out), biases as (1, out)."""
    ks = jax.random.split(key, 6)
    bnd_l = 1.0 / jnp.sqrt(input_dims)
    bnd_d = 1.0 / jnp.sqrt(hidden_dims)
    wv = jax.random.uniform(ks[0], (input_dims, hidden_dims), jnp.float32, -bnd_l, bnd_l)
    bv = jax.random.uniform(ks[1], (1, hidden_dims), jnp.float32, -bnd_l, bnd_l)
    wu = jax.random.uniform(ks[2], (input_dims, hidden_dims), jnp.float32, -bnd_l, bnd_l)
    bu = jax.random.uniform(ks[3], (1, hidden_dims), jnp.float32, -bnd_l, bnd_l)
    ww = jax.random.uniform(ks[4], (hidden_dims, attention_dims), jnp.float32, -bnd_d, bnd_d)
    bw = jax.random.uniform(ks[5], (1, attention_dims), jnp.float32, -bnd_d, bnd_d)
    return wv, bv, wu, bu, ww, bw


def reference_forward(features, params):
    wv, bv, wu, bu, ww, bw = params
    feats = features.reshape(-1, wv.shape[0])
    a_v = jnp.tanh(feats @ wv + bv)
    a_u = jax.nn.sigmoid(feats @ wu + bu)
    logits = (a_v * a_u) @ ww + bw
    attn = jax.nn.softmax(logits.T, axis=1)
    return attn, attn @ feats


if __name__ == "__main__":
    key = jax.random.PRNGKey(0)
    k_feat, k_param, k_feat2, k_param2 = jax.random.split(key, 4)

    # ---- small case matching the PyTorch module defaults -------------------
    input_dims, hidden_dims, attention_dims = 32, 16, 2
    batch, bag = 2, 4                                   # view(-1, L) -> N = 8
    features = jax.random.normal(k_feat, (batch, bag, input_dims), jnp.float32)
    params = init_params(k_param, input_dims, hidden_dims, attention_dims)

    attn, pooled = gated_attention_forward(features, params)
    jax.block_until_ready((attn, pooled))

    attn_ref, pooled_ref = reference_forward(features, params)
    assert attn.shape == (attention_dims, batch * bag)
    assert pooled.shape == (attention_dims, input_dims)
    assert jnp.allclose(attn, attn_ref, atol=1e-5, rtol=1e-4), "attn mismatch (small)"
    assert jnp.allclose(pooled, pooled_ref, atol=1e-5, rtol=1e-4), "pooled mismatch (small)"

    # ---- larger, non-aligned case: exercises streaming tiles, padding mask
    #      and the two-way split ("parallel") reduction -----------------------
    n2, l2, d2, k2 = 1000, 128, 16, 1
    features2 = jax.random.normal(k_feat2, (n2, l2), jnp.float32)
    params2 = init_params(k_param2, l2, d2, k2)

    attn2, pooled2 = gated_attention_forward(features2, params2,
                                             block_n=256, num_splits=2)
    jax.block_until_ready((attn2, pooled2))

    attn2_ref, pooled2_ref = reference_forward(features2, params2)
    assert attn2.shape == (k2, n2) and pooled2.shape == (k2, l2)
    assert jnp.allclose(attn2, attn2_ref, atol=1e-5, rtol=1e-4), "attn mismatch (tiled)"
    assert jnp.allclose(pooled2, pooled2_ref, atol=1e-5, rtol=1e-4), "pooled mismatch (tiled)"

    print("KERNEL_OK")
</pallas_src>

<mosaic_0001>
module attributes {stable_mosaic.version = 11 : i64} {
  func.func @_gated_attention_kernel(%arg0: i32, %arg1: i32, %arg2: memref<8x32xf32, #tpu.memory_space<vmem>>, %arg3: memref<32x32xf32, #tpu.memory_space<vmem>>, %arg4: memref<1x32xf32, #tpu.memory_space<vmem>>, %arg5: memref<16x2xf32, #tpu.memory_space<vmem>>, %arg6: memref<2x1xf32, #tpu.memory_space<vmem>>, %arg7: memref<2x8xf32, #tpu.memory_space<vmem>>, %arg8: memref<1x2x1xf32, #tpu.memory_space<vmem>>, %arg9: memref<1x2x1xf32, #tpu.memory_space<vmem>>, %arg10: memref<1x2x32xf32, #tpu.memory_space<vmem>>) attributes {dimension_semantics = [#tpu.dimension_semantics<parallel>, #tpu.dimension_semantics<arbitrary>], iteration_bounds = array<i64: 1, 1>, scalar_prefetch = 0 : i64, scratch_operands = 0 : i64, tpu.core_type = #tpu.core_type<tc>, window_params = [{transform_indices = @transform_0, window_bounds = array<i64: 8, 32>}, {pipeline_mode = #tpu.pipeline_mode<synchronous>, transform_indices = @transform_1, window_bounds = array<i64: 32, 32>}, {pipeline_mode = #tpu.pipeline_mode<synchronous>, transform_indices = @transform_2, window_bounds = array<i64: 1, 32>}, {pipeline_mode = #tpu.pipeline_mode<synchronous>, transform_indices = @transform_3, window_bounds = array<i64: 16, 2>}, {pipeline_mode = #tpu.pipeline_mode<synchronous>, transform_indices = @transform_4, window_bounds = array<i64: 2, 1>}, {transform_indices = @transform_5, window_bounds = array<i64: 2, 8>}, {transform_indices = @transform_6, window_bounds = array<i64: 1, 2, 1>}, {transform_indices = @transform_7, window_bounds = array<i64: 1, 2, 1>}, {transform_indices = @transform_8, window_bounds = array<i64: 1, 2, 32>}]} {
    %c0_i32 = arith.constant 0 : i32
    %0 = arith.cmpi eq, %arg1, %c0_i32 : i32
    %1 = arith.extui %0 : i1 to i32
    %c0_i32_0 = arith.constant 0 : i32
    %2 = arith.cmpi ne, %1, %c0_i32_0 : i32
    scf.if %2 {
      %cst_38 = arith.constant 0xFF800000 : f32
      %67 = vector.broadcast %cst_38 : f32 to vector<1x2x1xf32>
      %c0_39 = arith.constant 0 : index
      %c0_40 = arith.constant 0 : index
      %c0_41 = arith.constant 0 : index
      %68 = vector.load %arg8[%c0_39, %c0_40, %c0_41] : memref<1x2x1xf32, #tpu.memory_space<vmem>>, vector<1x2x1xf32>
      tpu.vector_store %arg8[%c0_39, %c0_40, %c0_41], %67 {strides = array<i32>} : memref<1x2x1xf32, #tpu.memory_space<vmem>>, vector<1x2x1xf32>,
      %cst_42 = arith.constant 0.000000e+00 : f32
      %69 = vector.broadcast %cst_42 : f32 to vector<1x2x1xf32>
      %c0_43 = arith.constant 0 : index
      %c0_44 = arith.constant 0 : index
      %c0_45 = arith.constant 0 : index
      %70 = vector.load %arg9[%c0_43, %c0_44, %c0_45] : memref<1x2x1xf32, #tpu.memory_space<vmem>>, vector<1x2x1xf32>
      tpu.vector_store %arg9[%c0_43, %c0_44, %c0_45], %69 {strides = array<i32>} : memref<1x2x1xf32, #tpu.memory_space<vmem>>, vector<1x2x1xf32>,
      %cst_46 = arith.constant 0.000000e+00 : f32
      %71 = vector.broadcast %cst_46 : f32 to vector<1x2x32xf32>
      %c0_47 = arith.constant 0 : index
      %c0_48 = arith.constant 0 : index
      %c0_49 = arith.constant 0 : index
      %72 = vector.load %arg10[%c0_47, %c0_48, %c0_49] : memref<1x2x32xf32, #tpu.memory_space<vmem>>, vector<1x2x32xf32>
      tpu.vector_store %arg10[%c0_47, %c0_48, %c0_49], %71 {strides = array<i32>} : memref<1x2x32xf32, #tpu.memory_space<vmem>>, vector<1x2x32xf32>,
    } else {
    }
    %c0 = arith.constant 0 : index
    %c0_1 = arith.constant 0 : index
    %3 = vector.load %arg2[%c0, %c0_1] : memref<8x32xf32, #tpu.memory_space<vmem>>, vector<8x32xf32>
    %c0_2 = arith.constant 0 : index
    %c0_3 = arith.constant 0 : index
    %4 = vector.load %arg3[%c0_2, %c0_3] : memref<32x32xf32, #tpu.memory_space<vmem>>, vector<32x32xf32>
    %cst = arith.constant dense<0.000000e+00> : vector<8x32xf32>
    %5 = tpu.matmul %3, %4, %cst {dimension_numbers = #tpu.dot_dimension_numbers<[1], [0], [0], [1], [0, 0, 1, 1], [], []>} : vector<8x32xf32>, vector<32x32xf32>, vector<8x32xf32> -> vector<8x32xf32>
    %c0_4 = arith.constant 0 : index
    %c0_5 = arith.constant 0 : index
    %6 = vector.load %arg4[%c0_4, %c0_5] : memref<1x32xf32, #tpu.memory_space<vmem>>, vector<1x32xf32>
    %7 = vector.broadcast %6 : vector<1x32xf32> to vector<8x32xf32>
    %8 = arith.addf %5, %7 : vector<8x32xf32>
    %9 = vector.extract_strided_slice %8 {offsets = [0, 0], sizes = [8, 16], strides = [1, 1]} : vector<8x32xf32> to vector<8x16xf32>
    %10 = math.tanh %9 : vector<8x16xf32>
    %11 = vector.extract_strided_slice %8 {offsets = [0, 16], sizes = [8, 16], strides = [1, 1]} : vector<8x32xf32> to vector<8x16xf32>
    %12 = arith.negf %11 : vector<8x16xf32>
    %13 = math.exp %12 : vector<8x16xf32>
    %cst_6 = arith.constant 1.000000e+00 : f32
    %14 = vector.broadcast %cst_6 : f32 to vector<8x16xf32>
    %15 = arith.addf %14, %13 : vector<8x16xf32>
    %16 = arith.divf %14, %15 : vector<8x16xf32>
    %17 = arith.mulf %10, %16 : vector<8x16xf32>
    %c0_7 = arith.constant 0 : index
    %c0_8 = arith.constant 0 : index
    %18 = vector.load %arg5[%c0_7, %c0_8] : memref<16x2xf32, #tpu.memory_space<vmem>>, vector<16x2xf32>
    %cst_9 = arith.constant dense<0.000000e+00> : vector<2x8xf32>
    %19 = tpu.matmul %18, %17, %cst_9 {dimension_numbers = #tpu.dot_dimension_numbers<[0], [1], [1], [0], [0, 1, 1, 0], [], []>} : vector<16x2xf32>, vector<8x16xf32>, vector<2x8xf32> -> vector<2x8xf32>
    %c0_10 = arith.constant 0 : index
    %c0_11 = arith.constant 0 : index
    %20 = vector.load %arg6[%c0_10, %c0_11] : memref<2x1xf32, #tpu.memory_space<vmem>>, vector<2x1xf32>
    %21 = vector.broadcast %20 : vector<2x1xf32> to vector<2x8xf32>
    %22 = arith.addf %19, %21 : vector<2x8xf32>
    %c1_i32 = arith.constant 1 : i32
    %23 = arith.muli %arg0, %c1_i32 : i32
    %24 = arith.addi %23, %arg1 : i32
    %c8_i32 = arith.constant 8 : i32
    %25 = arith.muli %24, %c8_i32 : i32
    %26 = tpu.iota {dimensions = array<i32: 1>} : vector<2x8xi32>
    %27 = vector.broadcast %25 : i32 to vector<2x8xi32>
    %28 = arith.addi %27, %26 : vector<2x8xi32>
    %c8_i32_12 = arith.constant 8 : i32
    %29 = vector.broadcast %c8_i32_12 : i32 to vector<2x8xi32>
    %30 = arith.cmpi slt, %28, %29 : vector<2x8xi32>
    %cst_13 = arith.constant -1.000000e+30 : f32
    %31 = vector.broadcast %cst_13 : f32 to vector<2x8xf32>
    %32 = arith.select %30, %22, %31 : vector<2x8xi1>, vector<2x8xf32>
    %c0_14 = arith.constant 0 : index
    %c0_15 = arith.constant 0 : index
    %33 = vector.load %arg7[%c0_14, %c0_15] : memref<2x8xf32, #tpu.memory_space<vmem>>, vector<2x8xf32>
    tpu.vector_store %arg7[%c0_14, %c0_15], %32 {strides = array<i32>} : memref<2x8xf32, #tpu.memory_space<vmem>>, vector<2x8xf32>,
    %c0_16 = arith.constant 0 : index
    %c0_17 = arith.constant 0 : index
    %c0_18 = arith.constant 0 : index
    %34 = vector.load %arg8[%c0_16, %c0_17, %c0_18] : memref<1x2x1xf32, #tpu.memory_space<vmem>>, vector<1x2x1xf32>
    %35 = vector.shape_cast %34 : vector<1x2x1xf32> to vector<2x1xf32>
    %cst_19 = arith.constant dense<0xFF800000> : vector<2xf32>
    %36 = vector.multi_reduction <maximumf>, %32, %cst_19 [1] : vector<2x8xf32> to vector<2xf32>
    %37 = vector.shape_cast %36 : vector<2xf32> to vector<2x1xf32>
    %38 = arith.maximumf %35, %37 : vector<2x1xf32>
    %39 = arith.subf %35, %38 : vector<2x1xf32>
    %40 = math.exp %39 : vector<2x1xf32>
    %41 = vector.broadcast %38 : vector<2x1xf32> to vector<2x8xf32>
    %42 = arith.subf %32, %41 : vector<2x8xf32>
    %43 = math.exp %42 : vector<2x8xf32>
    %cst_20 = arith.constant 0.000000e+00 : f32
    %44 = vector.broadcast %cst_20 : f32 to vector<2x8xf32>
    %45 = arith.select %30, %43, %44 : vector<2x8xi1>, vector<2x8xf32>
    %c0_21 = arith.constant 0 : index
    %c0_22 = arith.constant 0 : index
    %c0_23 = arith.constant 0 : index
    %46 = vector.load %arg9[%c0_21, %c0_22, %c0_23] : memref<1x2x1xf32, #tpu.memory_space<vmem>>, vector<1x2x1xf32>
    %47 = vector.shape_cast %46 : vector<1x2x1xf32> to vector<2x1xf32>
    %48 = arith.mulf %40, %47 : vector<2x1xf32>
    %cst_24 = arith.constant dense<0.000000e+00> : vector<2xf32>
    %49 = vector.multi_reduction <add>, %45, %cst_24 [1] : vector<2x8xf32> to vector<2xf32>
    %50 = vector.shape_cast %49 : vector<2xf32> to vector<2x1xf32>
    %51 = arith.addf %48, %50 : vector<2x1xf32>
    %c0_25 = arith.constant 0 : index
    %c0_26 = arith.constant 0 : index
    %c0_27 = arith.constant 0 : index
    %52 = vector.load %arg9[%c0_25, %c0_26, %c0_27] : memref<1x2x1xf32, #tpu.memory_space<vmem>>, vector<1x2x1xf32>
    %53 = vector.shape_cast %52 : vector<1x2x1xf32> to vector<2x1xf32>
    %54 = vector.shape_cast %51 : vector<2x1xf32> to vector<1x2x1xf32>
    tpu.vector_store %arg9[%c0_25, %c0_26, %c0_27], %54 {strides = array<i32>} : memref<1x2x1xf32, #tpu.memory_space<vmem>>, vector<1x2x1xf32>,
    %c0_28 = arith.constant 0 : index
    %c0_29 = arith.constant 0 : index
    %c0_30 = arith.constant 0 : index
    %55 = vector.load %arg10[%c0_28, %c0_29, %c0_30] : memref<1x2x32xf32, #tpu.memory_space<vmem>>, vector<1x2x32xf32>
    %56 = vector.shape_cast %55 : vector<1x2x32xf32> to vector<2x32xf32>
    %57 = vector.broadcast %40 : vector<2x1xf32> to vector<2x32xf32>
    %58 = arith.mulf %57, %56 : vector<2x32xf32>
    %cst_31 = arith.constant dense<0.000000e+00> : vector<2x32xf32>
    %59 = tpu.matmul %45, %3, %cst_31 {dimension_numbers = #tpu.dot_dimension_numbers<[1], [0], [0], [1], [0, 0, 1, 1], [], []>} : vector<2x8xf32>, vector<8x32xf32>, vector<2x32xf32> -> vector<2x32xf32>
    %60 = arith.addf %58, %59 : vector<2x32xf32>
    %c0_32 = arith.constant 0 : index
    %c0_33 = arith.constant 0 : index
    %c0_34 = arith.constant 0 : index
    %61 = vector.load %arg10[%c0_32, %c0_33, %c0_34] : memref<1x2x32xf32, #tpu.memory_space<vmem>>, vector<1x2x32xf32>
    %62 = vector.shape_cast %61 : vector<1x2x32xf32> to vector<2x32xf32>
    %63 = vector.shape_cast %60 : vector<2x32xf32> to vector<1x2x32xf32>
    tpu.vector_store %arg10[%c0_32, %c0_33, %c0_34], %63 {strides = array<i32>} : memref<1x2x32xf32, #tpu.memory_space<vmem>>, vector<1x2x32xf32>,
    %c0_35 = arith.constant 0 : index
    %c0_36 = arith.constant 0 : index
    %c0_37 = arith.constant 0 : index
    %64 = vector.load %arg8[%c0_35, %c0_36, %c0_37] : memref<1x2x1xf32, #tpu.memory_space<vmem>>, vector<1x2x1xf32>
    %65 = vector.shape_cast %64 : vector<1x2x1xf32> to vector<2x1xf32>
    %66 = vector.shape_cast %38 : vector<2x1xf32> to vector<1x2x1xf32>
    tpu.vector_store %arg8[%c0_35, %c0_36, %c0_37], %66 {strides = array<i32>} : memref<1x2x1xf32, #tpu.memory_space<vmem>>, vector<1x2x1xf32>,
    return
  }
  func.func @transform_0(%arg0: i32, %arg1: i32) -> (i32, i32) {
    %c1_i32 = arith.constant 1 : i32
    %0 = arith.muli %arg0, %c1_i32 : i32
    %1 = arith.addi %0, %arg1 : i32
    %c0_i32 = arith.constant 0 : i32
    %c0_i32_0 = arith.constant 0 : i32
    return %1, %c0_i32 : i32, i32
  }
  func.func @transform_1(%arg0: i32, %arg1: i32) -> (i32, i32) {
    %c0_i32 = arith.constant 0 : i32
    %c0_i32_0 = arith.constant 0 : i32
    %c0_i32_1 = arith.constant 0 : i32
    return %c0_i32, %c0_i32_0 : i32, i32
  }
  func.func @transform_2(%arg0: i32, %arg1: i32) -> (i32, i32) {
    %c0_i32 = arith.constant 0 : i32
    %c0_i32_0 = arith.constant 0 : i32
    %c0_i32_1 = arith.constant 0 : i32
    return %c0_i32, %c0_i32_0 : i32, i32
  }
  func.func @transform_3(%arg0: i32, %arg1: i32) -> (i32, i32) {
    %c0_i32 = arith.constant 0 : i32
    %c0_i32_0 = arith.constant 0 : i32
    %c0_i32_1 = arith.constant 0 : i32
    return %c0_i32, %c0_i32_0 : i32, i32
  }
  func.func @transform_4(%arg0: i32, %arg1: i32) -> (i32, i32) {
    %c0_i32 = arith.constant 0 : i32
    %c0_i32_0 = arith.constant 0 : i32
    %c0_i32_1 = arith.constant 0 : i32
    return %c0_i32, %c0_i32_0 : i32, i32
  }
  func.func @transform_5(%arg0: i32, %arg1: i32) -> (i32, i32) {
    %c1_i32 = arith.constant 1 : i32
    %0 = arith.muli %arg0, %c1_i32 : i32
    %1 = arith.addi %0, %arg1 : i32
    %c0_i32 = arith.constant 0 : i32
    %c0_i32_0 = arith.constant 0 : i32
    return %c0_i32, %1 : i32, i32
  }
  func.func @transform_6(%arg0: i32, %arg1: i32) -> (i32, i32, i32) {
    %c0_i32 = arith.constant 0 : i32
    %c0_i32_0 = arith.constant 0 : i32
    %c0_i32_1 = arith.constant 0 : i32
    return %arg0, %c0_i32, %c0_i32_0 : i32, i32, i32
  }
  func.func @transform_7(%arg0: i32, %arg1: i32) -> (i32, i32, i32) {
    %c0_i32 = arith.constant 0 : i32
    %c0_i32_0 = arith.constant 0 : i32
    %c0_i32_1 = arith.constant 0 : i32
    return %arg0, %c0_i32, %c0_i32_0 : i32, i32, i32
  }
  func.func @transform_8(%arg0: i32, %arg1: i32) -> (i32, i32, i32) {
    %c0_i32 = arith.constant 0 : i32
    %c0_i32_0 = arith.constant 0 : i32
    %c0_i32_1 = arith.constant 0 : i32
    return %arg0, %c0_i32, %c0_i32_0 : i32, i32, i32
  }
}

</mosaic_0001>

<bundles_post_ra>
// kernel: tpu_custom_call.1
= control target key start
LH: loop header
LB: loop body
LE: loop exit
PB: predicated region body
PF: predicated region fallthrough
CT: control target
= control target key end

     0   :  { %14 = vsyncpa [#allocation3], 0  ;;  %s527_s0 = inlined_call_operand.vmem [shape: f32[8,32], index: 0, kind: input, shape index: {}]   ;;  %s528_s1 = inlined_call_operand.hbm [shape: f32[32,32], index: 1, kind: input, shape index: {}]   ;;  %s529_s2 = inlined_call_operand.vmem [shape: f32[1,32], index: 2, kind: input, shape index: {}]   ;;  %s530_s3 = inlined_call_operand.vmem [shape: f32[16,2], index: 3, kind: input, shape index: {}]   ;;  %s531_s4 = inlined_call_operand.vmem [shape: f32[2,1], index: 4, kind: input, shape index: {}]   ;;  %s532_s5 = inlined_call_operand.hbm [shape: f32[2,8], index: 5, kind: output, shape index: {0}]   ;;  %s533_s6 = inlined_call_operand.vmem [shape: f32[1,2,1], index: 6, kind: output, shape index: {1}]   ;;  %s534_s7 = inlined_call_operand.vmem [shape: f32[1,2,1], index: 7, kind: output, shape index: {2}]   ;;  %s535_s8 = inlined_call_operand.hbm [shape: f32[1,2,32], index: 8, kind: output, shape index: {3}]  }
   0x1   :  { %15 = vsyncpa [#allocation4], 0 }
   0x2   :  { %16 = vsyncpa [#allocation7], 0  ;;  %s29_s29 = sshll.u32 %s528_s1, 4  ;;  %s420_s30 = smov [#allocation2]   ;;  %s30_s29 = int_to_ptr.hbm [resolvable:$true] %s29_s29 }
   0x3   :  { %s31_s9 = sshll.u32 %s420_s30, 4  ;;  %s421_s10 = smov 128   ;;  %s32_s9 = int_to_ptr.vmem [resolvable:$true] %s31_s9 }
   0x4   :  { %s422_s11 = smov 8  }
   0x5   :  { %37 = dma.hbm_to_vmem [thread:$0]  %s30_s29, 512, %s32_s9, [#allocation3], %s421_s10, %s421_s10, %s422_s11  }
   0x6   :  { %414 = dma.done.wait [#allocation3], 512  }
   0x7   :  { %415 = vsyncadd [#allocation3], 4294966784  ;;  %v73_v0 = vld [vmem:[#allocation2 + $0x18] sm:$0xff]  ;;  %v72_v1 = vld [vmem:[#allocation2 + $0x10] sm:$0xff]  ;;  %vm78_vm0 = vcmask 261120   ;;  %vm167_vm5 = vcmask 130048   ;;  %v196_v30 = vlaneseq }
   0x8   :  { %94 = vmatpush.msra.mxu0 %v73_v0  ;;  %v69_v2 = vld [vmem:[%s527_s0] sm:$0xff]  ;;  %v71_v3 = vld [vmem:[#allocation2 + $0x8] sm:$0xff]  ;;  %s423_s0 = smov 112   ;;  %v424_v27 = vmov 0   ;;  %vm64_vm6 = vcmask 1024   ;;  %v425_v29 = vmov -inf  }
   0x9   :  { %255 = vmatpush.msra.mxu2 %v69_v2  ;;  %v70_v4 = vld [vmem:[#allocation2] sm:$0xff]  ;;  %v128_v22 = vld [vmem:[%s530_s3 + $0x8] sm:$0xff]  ;;  %328 = vset.pattern.permute.xlu1 %v424_v27  ;;  %65 = vst.msk [vmem:[%s533_s6] sm:$0x3] %vm64_vm6, %v425_v29  ;;  %v197_v31 = vand.u32 127, %v196_v30  ;;  %vm202_vm8 = vcmask 58368  }
   0xa   :  { %95 = vmatpush.msra.mxu0 %v72_v1  ;;  %v331_v5 = vld [vmem:[%s529_s2] ss:$0 sm:$0xff]  ;;  %329 = vset.pattern.permute.xlu2 %v424_v27  ;;  %v426_v37 = vmov 0.0   ;;  %vm67_vm9 = vcmask 254976   ;;  %vm236_vm10 = vcmask 64512   ;;  %s274_s29 = sshll.u32 %s532_s5, 4  ;;  %s275_s29 = int_to_ptr.hbm [resolvable:$true] %s274_s29 }
   0xb   :  { %v127_v21 = vld [vmem:[%s530_s3] sm:$0xff]  ;;  %vm200_vm7 = vcmp.lt.s32.totalorder %v197_v31, 8  ;;  %66 = vst.msk [vmem:[%s534_s7] sm:$0x3] %vm64_vm6, %v426_v37  ;;  %s428_s12 = smov [#allocation6]   ;;  %s289_s14 = sshll.u32 %s535_s8, 4  ;;  %s290_s14 = int_to_ptr.hbm [resolvable:$true] %s289_s14 }
   0xc   :  { %96 = vmatpush.msra.mxu0 %v71_v3  ;;  %v129_v26 = vld [vmem:[%s531_s4] sm:$0x3]  ;;  %68 = vst.msk [vmem:[#allocation6] sm:$0x3] %vm67_vm9, %v426_v37  ;;  %s287_s13 = sshll.u32 %s428_s12, 4  ;;  %s288_s13 = int_to_ptr.vmem [resolvable:$true] %s287_s13 }
   0xd   :  { %132 = vperm.xlu1 %328, %v129_v26  }
   0xe   :  { %97 = vmatpush.msra.mxu0 %v70_v4 }
   0xf   :  { %314 = vmatmul.msk.f32.vlgmr.msra.gmra.mxu0 %vm78_vm0, %v69_v2 }
  0x10   :  { %v204_v38 = vld [vmem:[%s533_s6] sm:$0x3] }
  0x12   :  { %v221_v51 = vld [vmem:[%s534_s7] sm:$0x3] }
  0x13   :  { %v229_v55 = vld [vmem:[#allocation6] sm:$0x3] }
  0x7f   :  { %v133_v32 = vpop.permute.xlu1 %132 }
  0x8c   :  { %v99_v6 = vpop.f32.mrf.mxu0 }
  0x8d   :  { %v100_v7 = vadd.f32 %v331_v5, %v99_v6 }
  0x8f   :  { %v315_v8 = vmul.f32 -1.442695, %v100_v7 }
  0x91   :  { %332 = vpow2.f32 %v315_v8 }
  0x97   :  { %v333_v9 = vpop.eup %332 }
  0x98   :  { %v106_v10 = vadd.f32 1.0, %v333_v9 }
  0x9a   :  { %334 = vrcp.f32 %v106_v10  ;;  %v118_v14 = vand.u32 2147483648, %v106_v10  ;;  %v116_v16 = vand.u32 2147483647, %v106_v10  ;;  %vm112_vm2 = vweird.f32 %v106_v10 }
  0x9b   :  { %336 = vtanh.f32 %v100_v7 }
  0x9c   :  { %v119_v18 = vor.u32 1.1754944e-38, %v118_v14  ;;  %vm117_vm4 = vcmp.eq.f32.partialorder %v116_v16, 8.507059e+37 }
  0xa0   :  { %v335_v11 = vpop.eup %334 }
  0xa1   :  { %v108_v12 = vmul.f32 %v335_v11, %v106_v10  ;;  %vm113_vm1 = vweird.f32 %v335_v11  ;;  %v337_v23 = vpop.eup %336 }
  0xa2   :  { %vm114_vm3 = vmor %vm112_vm2, %vm113_vm1 }
  0xa3   :  { %v109_v13 = vsub.f32 1.0, %v108_v12 }
  0xa5   :  { %v110_v15 = vmul.f32 %v335_v11, %v109_v13 }
  0xa7   :  { %v111_v17 = vadd.f32 %v335_v11, %v110_v15 }
  0xa9   :  { %v115_v19 = vsel %vm114_vm3, %v335_v11, %v111_v17 }
  0xaa   :  { %v120_v20 = vsel %vm117_vm4, %v119_v18, %v115_v19 }
  0xab   :  { %123 = vrot.lane.b32.xlu0 %v120_v20, %s423_s0 }
  0xcd   :  { %135 = vxpose.xlu0.b32.start [1/2] (short) (narrow) %v127_v21, 8 }
  0xd5   :  { %136 = vxpose.xlu0.b32.end [2/2] (short) (narrow) %v128_v22, 8 }
 0x11d   :  { %v124_v24 = vpop.permute.xlu0 %123 }
 0x11e   :  { %v126_v25 = vmul.f32 %v337_v23, %v124_v24 }
 0x120   :  { %316 = vmatpush.xpose.msk.msra.mxu1 %vm167_vm5, %v126_v25 }
 0x13c   :  { %330 = vset.pattern.permute.xlu0 %v424_v27 }
 0x171   :  { %v151_v28 = vpop.trf.xlu0 }
 0x172   :  { %317 = vmatmul.msk.f32.vlgmr.msra.gmra.mxu1 %vm167_vm5, %v151_v28 }
 0x1ef   :  { %v191_v33 = vpop.f32.mrf.mxu1 }
 0x1f0   :  { %v192_v34 = vadd.f32 %v191_v33, %v133_v32 }
 0x1f2   :  { %v201_v35 = vsel %vm200_vm7, %v192_v34, -1e+30 }
 0x1f3   :  { %v205_v36 = vsel %vm202_vm8, %v201_v35, -inf  ;;  %203 = vst.msk [vmem:[#allocation5] sm:$0x3] %vm202_vm8, %v201_v35 }
 0x1f4   :  { %206 = vmax.xlane.f32.xlu1 %v205_v36 }
 0x267   :  { %v207_v39 = vpop.xlane.xlu1 %206 }
 0x268   :  { %v208_v40 = vmax.f32 %v204_v38, %v207_v39 }
 0x26a   :  { %v209_v41 = vsub.f32 %v204_v38, %v208_v40  ;;  %263 = vst.msk [vmem:[%s533_s6] sm:$0x3] %vm64_vm6, %v208_v40  ;;  %214 = vperm.xlu2 %329, %v208_v40   ;;  %s427_s6 = smov [#allocation5]  }
 0x26b   :  { %s272_s26 = sshll.u32 %s427_s6, 4  ;;  %s273_s26 = int_to_ptr.vmem [resolvable:$true] %s272_s26 }
 0x26c   :  { %v210_v42 = vmul.f32 1.442695, %v209_v41  ;;  %277 = dma.vmem_to_hbm [thread:$0]  %s273_s26, 32, %s275_s29, [#allocation4]  }
 0x26e   :  { %338 = vpow2.f32 %v210_v42 }
 0x274   :  { %v339_v43 = vpop.eup %338 }
 0x275   :  { %232 = vperm.xlu2 %329, %v339_v43   ;;  %v222_v52 = vmul.f32 %v339_v43, %v221_v51 }
 0x2c4   :  { %v215_v44 = vpop.permute.xlu2 %214 }
 0x2c5   :  { %v217_v45 = vsub.f32 %v201_v35, %v215_v44 }
 0x2c7   :  { %v218_v46 = vmul.f32 1.442695, %v217_v45 }
 0x2c9   :  { %340 = vpow2.f32 %v218_v46 }
 0x2cf   :  { %v341_v47 = vpop.eup %340  ;;  %v233_v50 = vpop.permute.xlu2 %232 }
 0x2d0   :  { %v220_v48 = vsel %vm200_vm7, %v341_v47, 0.0  ;;  %v235_v56 = vmul.f32 %v233_v50, %v229_v55 }
 0x2d1   :  { %318 = vmatmul.msk.f32.vlgmr.msra.gmra.mxu2 %vm236_vm10, %v220_v48  ;;  %v223_v49 = vsel %vm202_vm8, %v220_v48, 0.0 }
 0x2d2   :  { %224 = vadd.xlane.f32.xlu2 %v223_v49 }
 0x345   :  { %v225_v53 = vpop.xlane.xlu2 %224 }
 0x346   :  { %v226_v54 = vadd.f32 %v225_v53, %v222_v52 }
 0x348   :  { %228 = vst.msk [vmem:[%s534_s7] sm:$0x3] %vm64_vm6, %v226_v54 }
 0x354   :  { %v257_v57 = vpop.f32.mrf.mxu2 }
 0x355   :  { %v260_v58 = vadd.f32 %v257_v57, %v235_v56 }
 0x357   :  { %262 = vst.msk [vmem:[#allocation6] sm:$0x3] %vm67_vm9, %v260_v58 }
 0x358   :  { %292 = dma.vmem_to_hbm [thread:$0]  %s288_s13, 32, %s290_s14, [#allocation7]  }
 0x359   :  { %416 = dma.done.wait [#allocation4], 32  }
 0x35a   :  { %417 = vsyncadd [#allocation4], 4294967264 }
 0x35b   :  { %418 = dma.done.wait [#allocation7], 32  }
 0x35c   :  { %419 = vsyncadd [#allocation7], 4294967264 }
 0x35d   :  { %305 = vsyncpa [#allocation3], 1 }
 0x35e   :  { %306 = vsyncpa [#allocation4], 1 }
 0x35f   :  { %307 = vsyncpa [#allocation7], 1 }

</bundles_post_ra>
